<compile_context>
chip_gen: v7x
topology: tpu7x:2x2x1
jax: 0.10.0
libtpu: 0.0.40
codegen_flags: <defaults>
</compile_context>

<pallas_src>
import functools
import math

import numpy as np
import jax
import jax.numpy as jnp
from jax.experimental import pallas as pl
from jax.experimental.pallas import tpu as pltpu


# ----------------------------- in-kernel helpers -----------------------------

def _gelu_tanh(x):
    # tanh-approx GELU (f32); tanh lowers to the EUP (an otherwise idle slot).
    # Differs from torch's exact-erf nn.GELU() by < ~1e-3 abs.
    c = 0.7978845608028654  # sqrt(2/pi)
    return 0.5 * x * (1.0 + jnp.tanh(c * (x + 0.044715 * x * x * x)))


def _layer_norm(x, w, b, eps=1e-5):
    # One-pass statistics: var = E[x^2] - E[x]^2 (halves cross-lane reductions).
    mu = jnp.mean(x, axis=-1, keepdims=True)
    ex2 = jnp.mean(x * x, axis=-1, keepdims=True)
    var = jnp.maximum(ex2 - mu * mu, 0.0)
    return (x - mu) * jax.lax.rsqrt(var + eps) * w + b


# ---------------------------------- kernel ------------------------------------

def _ffn_kernel(x_ref, w1_ref, b1_ref, w2_ref, b2_ref, lnw_ref, lnb_ref, o_ref,
                *, d_model, pack):
    """Fused GELU(x@W1+b1)@W2 + b2 + x, then LayerNorm, for one row tile.

    When pack == 2 the I/O refs hold two d_model-wide rows per 128-lane row
    (lane-dense layout).  The unpack below reorders rows within the tile to
    (evens, odds); the repack at the end is its exact inverse, so the wrapper
    sees the original row-major layout.  All rows are independent, so the
    permutation is harmless.
    """
    xp = x_ref[...]                                      # (ptm, pack*D) f32
    if pack == 2:
        ptm = xp.shape[0]
        x = jnp.concatenate([xp[:, :d_model], xp[:, d_model:]], axis=0)
    else:
        x = xp                                           # (tm, D)

    h = jnp.dot(x.astype(jnp.bfloat16), w1_ref[...],
                preferred_element_type=jnp.float32) + b1_ref[...]
    a = _gelu_tanh(h)                                    # f32, EUP tanh
    y = jnp.dot(a.astype(jnp.bfloat16), w2_ref[...],
                preferred_element_type=jnp.float32) + b2_ref[...]
    z = _layer_norm(y + x, lnw_ref[...], lnb_ref[...])   # residual + LN, f32

    if pack == 2:
        # Repack to lane-dense (inverse of the unpack), then cast once for the
        # full-lane (unmasked) bf16 store.
        z = jnp.concatenate([z[:ptm, :], z[ptm:, :]], axis=1)
    o_ref[...] = z.astype(o_ref.dtype)


# --------------------------------- wrapper ------------------------------------

def _round_up(n, m):
    return (n + m - 1) // m * m


def positionwise_ffn(x, p, *, max_tile_rows=2048, out_dtype=jnp.bfloat16):
    """x: (B, S, D) f32.  Returns LayerNorm(w2(GELU(w1 x + b1)) + b2 + x),
    shape (B, S, D), dtype `out_dtype` (bf16 by default: mem-bound kernel)."""
    B, S, D = x.shape
    F = p["w1"].shape[1]
    rows = B * S

    # Lane-dense packing factor: 2 when it makes the last dim a multiple of 128
    # (e.g. D = 64), otherwise leave rows as-is.
    pack = 2 if (2 * D) % 128 == 0 and D % 128 != 0 else 1
    Dp = D * pack
    prows_needed = pl.cdiv(rows, pack)          # packed rows needed

    # Tile sizing: bounded padding + at least 2 tiles when there is enough work
    # (so the "parallel" axis shards across both v7x TensorCores).
    max_ptile = max(16, max_tile_rows // pack)
    num_tiles = max(1, pl.cdiv(prows_needed, max_ptile))
    if num_tiles == 1 and prows_needed >= 32:
        num_tiles = 2
    # Single tile -> block == full array (any row count is legal).  Multi-tile
    # -> 16-aligned packed rows so bf16 output blocks sit on packed-sublane
    # boundaries.
    align = 8 if num_tiles == 1 else 16
    ptm = _round_up(pl.cdiv(prows_needed, num_tiles), align)
    prows = ptm * num_tiles
    padded = prows * pack                        # unpacked rows fed to kernel

    x2 = x.reshape(rows, D)
    if padded != rows:
        # Bounded pad (a handful of sublane rows); zero for typical transformer
        # row counts, so the common case has no extra HBM pass at all.
        x2 = jnp.pad(x2, ((0, padded - rows), (0, 0)))
    xp = x2.reshape(prows, Dp)                   # free row-major reshape

    # MXU operands in bf16 (cast once here); VPU/EUP math stays f32.
    w1 = p["w1"].astype(jnp.bfloat16)
    w2 = p["w2"].astype(jnp.bfloat16)
    b1 = p["b1"].reshape(1, F).astype(jnp.float32)
    b2 = p["b2"].reshape(1, D).astype(jnp.float32)
    lnw = p["ln_w"].reshape(1, D).astype(jnp.float32)
    lnb = p["ln_b"].reshape(1, D).astype(jnp.float32)

    row_spec = pl.BlockSpec((ptm, Dp), lambda i: (i, 0))

    def full(shape):
        # Constant index_map: fetched once, resident across the whole grid.
        return pl.BlockSpec(shape, lambda i: (0, 0))

    out_bytes = np.dtype(out_dtype).itemsize
    cost = pl.CostEstimate(
        flops=4 * padded * D * F,                        # two matmuls
        transcendentals=padded * F,                      # tanh per hidden elem
        bytes_accessed=(padded * D * 4                   # x read (f32)
                        + padded * D * out_bytes         # output write
                        + 2 * D * F * 2                  # w1 + w2 (bf16)
                        + (F + 3 * D) * 4),              # biases + LN params
    )

    kernel = functools.partial(_ffn_kernel, d_model=D, pack=pack)

    out = pl.pallas_call(
        kernel,
        grid=(num_tiles,),
        in_specs=[row_spec,
                  full((D, F)), full((1, F)),
                  full((F, D)), full((1, D)),
                  full((1, D)), full((1, D))],
        out_specs=row_spec,
        out_shape=jax.ShapeDtypeStruct((prows, Dp), out_dtype),
        compiler_params=pltpu.CompilerParams(
            dimension_semantics=("parallel",)),          # megacore sharding
        cost_estimate=cost,
    )(xp, w1, b1, w2, b2, lnw, lnb)

    out = out.reshape(padded, D)                 # free reshape back to (rows,D)
    if padded != rows:
        out = out[:rows]
    return out.reshape(B, S, D)


# --------------------------- pure-JAX reference -------------------------------

def reference_forward(x, p):
    B, S, D = x.shape
    x2 = x.reshape(-1, D)
    a = jax.nn.gelu(x2 @ p["w1"] + p["b1"], approximate=False)  # torch nn.GELU()
    y = a @ p["w2"] + p["b2"] + x2                              # dropout = id
    mu = jnp.mean(y, axis=-1, keepdims=True)
    var = jnp.mean((y - mu) ** 2, axis=-1, keepdims=True)
    z = (y - mu) * jax.lax.rsqrt(var + 1e-5) * p["ln_w"] + p["ln_b"]
    return z.reshape(B, S, D)


# ----------------------------------- main --------------------------------------

if __name__ == "__main__":
    B, S = 2, 8
    d_model = 64          # args.bert_hidden_units
    d_ff = 4 * d_model    # 256

    key = jax.random.PRNGKey(0)
    ks = jax.random.split(key, 8)

    def lin_init(k, fan_in, shape):
        bound = 1.0 / math.sqrt(fan_in)
        return jax.random.uniform(k, shape, jnp.float32, -bound, bound)

    params = dict(
        w1=lin_init(ks[0], d_model, (d_model, d_ff)),
        b1=lin_init(ks[1], d_model, (d_ff,)),
        w2=lin_init(ks[2], d_ff, (d_ff, d_model)),
        b2=lin_init(ks[3], d_ff, (d_model,)),
        ln_w=jnp.ones((d_model,), jnp.float32),
        ln_b=jnp.zeros((d_model,), jnp.float32),
    )

    x = jax.random.normal(ks[4], (B, S, d_model), jnp.float32)

    out = positionwise_ffn(x, params)
    jax.block_until_ready(out)

    ref = reference_forward(x, params)
    np.testing.assert_allclose(np.asarray(out, dtype=np.float32),
                               np.asarray(ref), atol=2e-2, rtol=2e-2)

    print("KERNEL_OK")
</pallas_src>

<mosaic_0001>
module attributes {stable_mosaic.version = 11 : i64} {
  func.func @_ffn_kernel(%arg0: i32, %arg1: memref<8x128xf32, #tpu.memory_space<vmem>>, %arg2: memref<64x256xbf16, #tpu.memory_space<vmem>>, %arg3: memref<1x256xf32, #tpu.memory_space<vmem>>, %arg4: memref<256x64xbf16, #tpu.memory_space<vmem>>, %arg5: memref<1x64xf32, #tpu.memory_space<vmem>>, %arg6: memref<1x64xf32, #tpu.memory_space<vmem>>, %arg7: memref<1x64xf32, #tpu.memory_space<vmem>>, %arg8: memref<8x128xbf16, #tpu.memory_space<vmem>>) attributes {dimension_semantics = [#tpu.dimension_semantics<parallel>], iteration_bounds = array<i64: 1>, scalar_prefetch = 0 : i64, scratch_operands = 0 : i64, tpu.core_type = #tpu.core_type<tc>, window_params = [{transform_indices = @transform_0, window_bounds = array<i64: 8, 128>}, {pipeline_mode = #tpu.pipeline_mode<synchronous>, transform_indices = @transform_1, window_bounds = array<i64: 64, 256>}, {pipeline_mode = #tpu.pipeline_mode<synchronous>, transform_indices = @transform_2, window_bounds = array<i64: 1, 256>}, {pipeline_mode = #tpu.pipeline_mode<synchronous>, transform_indices = @transform_3, window_bounds = array<i64: 256, 64>}, {pipeline_mode = #tpu.pipeline_mode<synchronous>, transform_indices = @transform_4, window_bounds = array<i64: 1, 64>}, {pipeline_mode = #tpu.pipeline_mode<synchronous>, transform_indices = @transform_5, window_bounds = array<i64: 1, 64>}, {pipeline_mode = #tpu.pipeline_mode<synchronous>, transform_indices = @transform_6, window_bounds = array<i64: 1, 64>}, {transform_indices = @transform_7, window_bounds = array<i64: 8, 128>}]} {
    %c0 = arith.constant 0 : index
    %c0_0 = arith.constant 0 : index
    %0 = vector.load %arg1[%c0, %c0_0] : memref<8x128xf32, #tpu.memory_space<vmem>>, vector<8x128xf32>
    %1 = vector.extract_strided_slice %0 {offsets = [0, 0], sizes = [8, 64], strides = [1, 1]} : vector<8x128xf32> to vector<8x64xf32>
    %2 = vector.extract_strided_slice %0 {offsets = [0, 64], sizes = [8, 64], strides = [1, 1]} : vector<8x128xf32> to vector<8x64xf32>
    %3 = tpu.concatenate %1, %2 in 0 : vector<8x64xf32>, vector<8x64xf32> -> vector<16x64xf32>
    %4 = arith.truncf %3 : vector<16x64xf32> to vector<16x64xbf16>
    %c0_1 = arith.constant 0 : index
    %c0_2 = arith.constant 0 : index
    %5 = vector.load %arg2[%c0_1, %c0_2] : memref<64x256xbf16, #tpu.memory_space<vmem>>, vector<64x256xbf16>
    %cst = arith.constant dense<0.000000e+00> : vector<16x256xf32>
    %6 = tpu.matmul %4, %5, %cst {dimension_numbers = #tpu.dot_dimension_numbers<[1], [0], [0], [1], [0, 0, 1, 1], [], []>} : vector<16x64xbf16>, vector<64x256xbf16>, vector<16x256xf32> -> vector<16x256xf32>
    %c0_3 = arith.constant 0 : index
    %c0_4 = arith.constant 0 : index
    %7 = vector.load %arg3[%c0_3, %c0_4] : memref<1x256xf32, #tpu.memory_space<vmem>>, vector<1x256xf32>
    %8 = vector.broadcast %7 : vector<1x256xf32> to vector<16x256xf32>
    %9 = arith.addf %6, %8 : vector<16x256xf32>
    %cst_5 = arith.constant 5.000000e-01 : f32
    %10 = vector.broadcast %cst_5 : f32 to vector<16x256xf32>
    %11 = arith.mulf %10, %9 : vector<16x256xf32>
    %cst_6 = arith.constant 4.471500e-02 : f32
    %12 = vector.broadcast %cst_6 : f32 to vector<16x256xf32>
    %13 = arith.mulf %12, %9 : vector<16x256xf32>
    %14 = arith.mulf %13, %9 : vector<16x256xf32>
    %15 = arith.mulf %14, %9 : vector<16x256xf32>
    %16 = arith.addf %9, %15 : vector<16x256xf32>
    %cst_7 = arith.constant 0.797884583 : f32
    %17 = vector.broadcast %cst_7 : f32 to vector<16x256xf32>
    %18 = arith.mulf %17, %16 : vector<16x256xf32>
    %19 = math.tanh %18 : vector<16x256xf32>
    %cst_8 = arith.constant 1.000000e+00 : f32
    %20 = vector.broadcast %cst_8 : f32 to vector<16x256xf32>
    %21 = arith.addf %20, %19 : vector<16x256xf32>
    %22 = arith.mulf %11, %21 : vector<16x256xf32>
    %23 = arith.truncf %22 : vector<16x256xf32> to vector<16x256xbf16>
    %c0_9 = arith.constant 0 : index
    %c0_10 = arith.constant 0 : index
    %24 = vector.load %arg4[%c0_9, %c0_10] : memref<256x64xbf16, #tpu.memory_space<vmem>>, vector<256x64xbf16>
    %cst_11 = arith.constant dense<0.000000e+00> : vector<16x64xf32>
    %25 = tpu.matmul %23, %24, %cst_11 {dimension_numbers = #tpu.dot_dimension_numbers<[1], [0], [0], [1], [0, 0, 1, 1], [], []>} : vector<16x256xbf16>, vector<256x64xbf16>, vector<16x64xf32> -> vector<16x64xf32>
    %c0_12 = arith.constant 0 : index
    %c0_13 = arith.constant 0 : index
    %26 = vector.load %arg5[%c0_12, %c0_13] : memref<1x64xf32, #tpu.memory_space<vmem>>, vector<1x64xf32>
    %27 = vector.broadcast %26 : vector<1x64xf32> to vector<16x64xf32>
    %28 = arith.addf %25, %27 : vector<16x64xf32>
    %29 = arith.addf %28, %3 : vector<16x64xf32>
    %c0_14 = arith.constant 0 : index
    %c0_15 = arith.constant 0 : index
    %30 = vector.load %arg6[%c0_14, %c0_15] : memref<1x64xf32, #tpu.memory_space<vmem>>, vector<1x64xf32>
    %c0_16 = arith.constant 0 : index
    %c0_17 = arith.constant 0 : index
    %31 = vector.load %arg7[%c0_16, %c0_17] : memref<1x64xf32, #tpu.memory_space<vmem>>, vector<1x64xf32>
    %cst_18 = arith.constant dense<0.000000e+00> : vector<16xf32>
    %32 = vector.multi_reduction <add>, %29, %cst_18 [1] : vector<16x64xf32> to vector<16xf32>
    %33 = vector.shape_cast %32 : vector<16xf32> to vector<16x1xf32>
    %cst_19 = arith.constant 6.400000e+01 : f32
    %34 = vector.broadcast %cst_19 : f32 to vector<16x1xf32>
    %35 = arith.divf %33, %34 : vector<16x1xf32>
    %36 = arith.mulf %29, %29 : vector<16x64xf32>
    %cst_20 = arith.constant dense<0.000000e+00> : vector<16xf32>
    %37 = vector.multi_reduction <add>, %36, %cst_20 [1] : vector<16x64xf32> to vector<16xf32>
    %38 = vector.shape_cast %37 : vector<16xf32> to vector<16x1xf32>
    %cst_21 = arith.constant 6.400000e+01 : f32
    %39 = vector.broadcast %cst_21 : f32 to vector<16x1xf32>
    %40 = arith.divf %38, %39 : vector<16x1xf32>
    %41 = arith.mulf %35, %35 : vector<16x1xf32>
    %42 = arith.subf %40, %41 : vector<16x1xf32>
    %cst_22 = arith.constant 0.000000e+00 : f32
    %43 = vector.broadcast %cst_22 : f32 to vector<16x1xf32>
    %44 = arith.maximumf %42, %43 : vector<16x1xf32>
    %45 = vector.broadcast %35 : vector<16x1xf32> to vector<16x64xf32>
    %46 = arith.subf %29, %45 : vector<16x64xf32>
    %cst_23 = arith.constant 9.99999974E-6 : f32
    %47 = vector.broadcast %cst_23 : f32 to vector<16x1xf32>
    %48 = arith.addf %44, %47 : vector<16x1xf32>
    %49 = math.rsqrt %48 : vector<16x1xf32>
    %50 = vector.broadcast %49 : vector<16x1xf32> to vector<16x64xf32>
    %51 = arith.mulf %46, %50 : vector<16x64xf32>
    %52 = vector.broadcast %30 : vector<1x64xf32> to vector<16x64xf32>
    %53 = arith.mulf %51, %52 : vector<16x64xf32>
    %54 = vector.broadcast %31 : vector<1x64xf32> to vector<16x64xf32>
    %55 = arith.addf %53, %54 : vector<16x64xf32>
    %56 = vector.extract_strided_slice %55 {offsets = [0, 0], sizes = [8, 64], strides = [1, 1]} : vector<16x64xf32> to vector<8x64xf32>
    %57 = vector.extract_strided_slice %55 {offsets = [8, 0], sizes = [8, 64], strides = [1, 1]} : vector<16x64xf32> to vector<8x64xf32>
    %58 = tpu.concatenate %56, %57 in 1 : vector<8x64xf32>, vector<8x64xf32> -> vector<8x128xf32>
    %59 = arith.truncf %58 : vector<8x128xf32> to vector<8x128xbf16>
    %c0_24 = arith.constant 0 : index
    %c0_25 = arith.constant 0 : index
    %60 = vector.load %arg8[%c0_24, %c0_25] : memref<8x128xbf16, #tpu.memory_space<vmem>>, vector<8x128xbf16>
    tpu.vector_store %arg8[%c0_24, %c0_25], %59 {strides = array<i32>} : memref<8x128xbf16, #tpu.memory_space<vmem>>, vector<8x128xbf16>,
    return
  }
  func.func @transform_0(%arg0: i32) -> (i32, i32) {
    %c0_i32 = arith.constant 0 : i32
    %c0_i32_0 = arith.constant 0 : i32
    return %arg0, %c0_i32 : i32, i32
  }
  func.func @transform_1(%arg0: i32) -> (i32, i32) {
    %c0_i32 = arith.constant 0 : i32
    %c0_i32_0 = arith.constant 0 : i32
    %c0_i32_1 = arith.constant 0 : i32
    return %c0_i32, %c0_i32_0 : i32, i32
  }
  func.func @transform_2(%arg0: i32) -> (i32, i32) {
    %c0_i32 = arith.constant 0 : i32
    %c0_i32_0 = arith.constant 0 : i32
    %c0_i32_1 = arith.constant 0 : i32
    return %c0_i32, %c0_i32_0 : i32, i32
  }
  func.func @transform_3(%arg0: i32) -> (i32, i32) {
    %c0_i32 = arith.constant 0 : i32
    %c0_i32_0 = arith.constant 0 : i32
    %c0_i32_1 = arith.constant 0 : i32
    return %c0_i32, %c0_i32_0 : i32, i32
  }
  func.func @transform_4(%arg0: i32) -> (i32, i32) {
    %c0_i32 = arith.constant 0 : i32
    %c0_i32_0 = arith.constant 0 : i32
    %c0_i32_1 = arith.constant 0 : i32
    return %c0_i32, %c0_i32_0 : i32, i32
  }
  func.func @transform_5(%arg0: i32) -> (i32, i32) {
    %c0_i32 = arith.constant 0 : i32
    %c0_i32_0 = arith.constant 0 : i32
    %c0_i32_1 = arith.constant 0 : i32
    return %c0_i32, %c0_i32_0 : i32, i32
  }
  func.func @transform_6(%arg0: i32) -> (i32, i32) {
    %c0_i32 = arith.constant 0 : i32
    %c0_i32_0 = arith.constant 0 : i32
    %c0_i32_1 = arith.constant 0 : i32
    return %c0_i32, %c0_i32_0 : i32, i32
  }
  func.func @transform_7(%arg0: i32) -> (i32, i32) {
    %c0_i32 = arith.constant 0 : i32
    %c0_i32_0 = arith.constant 0 : i32
    return %arg0, %c0_i32 : i32, i32
  }
}

</mosaic_0001>

<bundles_post_ra>
// kernel: tpu_custom_call.1
= control target key start
LH: loop header
LB: loop body
LE: loop exit
PB: predicated region body
PF: predicated region fallthrough
CT: control target
= control target key end

     0   :  { %s546_s26 = smov 64   ;;  %v547_v3 = vmov 0   ;;  %s705_s0 = inlined_call_operand.vmem [shape: f32[8,128], index: 0, kind: input, shape index: {}]   ;;  %s706_s1 = inlined_call_operand.vmem [shape: bf16[64,256], index: 1, kind: input, shape index: {}]   ;;  %s707_s2 = inlined_call_operand.vmem [shape: f32[1,256], index: 2, kind: input, shape index: {}]   ;;  %s708_s3 = inlined_call_operand.vmem [shape: bf16[256,64], index: 3, kind: input, shape index: {}]   ;;  %s709_s4 = inlined_call_operand.vmem [shape: f32[1,64], index: 4, kind: input, shape index: {}]   ;;  %s710_s5 = inlined_call_operand.vmem [shape: f32[1,64], index: 5, kind: input, shape index: {}]   ;;  %s711_s6 = inlined_call_operand.vmem [shape: f32[1,64], index: 6, kind: input, shape index: {}]   ;;  %s712_s7 = inlined_call_operand.hbm [shape: bf16[8,128], index: 7, kind: output, shape index: {}]  }
   0x1   :  { %v592_v0 = vld [vmem:[%s705_s0] sm:$0xff]  ;;  %130 = vmatprep.mubr.bf16.mxu0 %v547_v3  ;;  %v485_v4 = vld [vmem:[%s706_s1 + $0x14] ss:$8 sps:$4 sm:$0xff]   ;;  %v487_v5 = vld [vmem:[%s706_s1 + $0x10] ss:$8 sps:$4 sm:$0xff]  }
   0x2   :  { %30 = vrot.lane.b32.xlu0 %v592_v0, %s546_s26  ;;  %v482_v1 = vld [vmem:[%s706_s1 + $0x4] ss:$8 sps:$4 sm:$0xff]   ;;  %v484_v2 = vld [vmem:[%s706_s1] ss:$8 sps:$4 sm:$0xff]   ;;  %v491_v8 = vld [vmem:[%s706_s1 + $0x34] ss:$8 sps:$4 sm:$0xff]  }
   0x3   :  { %98 = vmatprep.subr.bf16.mxu0 %v482_v1  ;;  %v488_v6 = vld [vmem:[%s706_s1 + $0x24] ss:$8 sps:$4 sm:$0xff]   ;;  %v490_v7 = vld [vmem:[%s706_s1 + $0x20] ss:$8 sps:$4 sm:$0xff]   ;;  %v493_v9 = vld [vmem:[%s706_s1 + $0x30] ss:$8 sps:$4 sm:$0xff]  }
   0x4   :  { %99 = vmatpush1.bf16.msra.mxu0 %v484_v2 }
   0x5   :  { %100 = vmatprep.subr.bf16.mxu0 %v485_v4 }
   0x8   :  { %101 = vmatpush1.bf16.msra.mxu0 %v487_v5 }
   0x9   :  { %102 = vmatprep.subr.bf16.mxu0 %v488_v6 }
   0xc   :  { %103 = vmatpush1.bf16.msra.mxu0 %v490_v7 }
   0xd   :  { %104 = vmatprep.subr.bf16.mxu0 %v491_v8 }
  0x10   :  { %105 = vmatpush1.bf16.msra.mxu0 %v493_v9 }
  0x11   :  { %12 = vsyncpa [#allocation3], 0  ;;  %vm94_vm0 = vcmask 523264   ;;  %v494_v12 = vld [vmem:[%s708_s3 + $0x40] sm:$0xff]   ;;  %v496_v14 = vld [vmem:[%s708_s3 + $0x48] sm:$0xff]   ;;  %v44_v28 = vlaneseq  ;;  %s548_s9 = smov [#allocation2]  }
  0x12   :  { %v495_v13 = vld [vmem:[%s708_s3] sm:$0xff]   ;;  %457 = vmatprep.subr.bf16.mxu1 %v494_v12  ;;  %v497_v15 = vld [vmem:[%s708_s3 + $0x8] sm:$0xff]   ;;  %v498_v16 = vld [vmem:[%s708_s3 + $0x50] sm:$0xff]   ;;  %s421_s0 = sshll.u32 %s548_s9, 4  ;;  %s422_s0 = int_to_ptr.vmem [resolvable:$true] %s421_s0 }
  0x13   :  { %458 = vmatpush3.bf16.msra.mxu1 %v495_v13  ;;  %v499_v17 = vld [vmem:[%s708_s3 + $0x10] sm:$0xff]   ;;  %v500_v18 = vld [vmem:[%s708_s3 + $0x58] sm:$0xff]   ;;  %v502_v20 = vld [vmem:[%s708_s3 + $0x60] sm:$0xff]   ;;  %v45_v29 = vshrl.u32 %v44_v28, 7  ;;  %p527_p1 = scmp.lt.s32.totalorder %s422_s0, %s422_s0 }
  0x14   :  { %459 = vmatprep.subr.bf16.mxu1 %v496_v14  ;;  %v501_v19 = vld [vmem:[%s708_s3 + $0x18] sm:$0xff]   ;;  %v503_v21 = vld [vmem:[%s708_s3 + $0x20] sm:$0xff]   ;;  %v504_v22 = vld [vmem:[%s708_s3 + $0x68] sm:$0xff]  }
  0x15   :  { %v505_v23 = vld [vmem:[%s708_s3 + $0x28] sm:$0xff]   ;;  %v506_v24 = vld [vmem:[%s708_s3 + $0x70] sm:$0xff]   ;;  %v508_v26 = vld [vmem:[%s708_s3 + $0x78] sm:$0xff]   ;;  %v46_v30 = vsub.s32 0, %v45_v29  ;;  %v50_v32 = vsub.s32 1, %v45_v29 }
  0x16   :  { %v507_v25 = vld [vmem:[%s708_s3 + $0x30] sm:$0xff]   ;;  %v509_v27 = vld [vmem:[%s708_s3 + $0x38] sm:$0xff]   ;;  %v42_v31 = vld [vmem:[%s707_s2] sm:$0x3] }
  0x17   :  { %460 = vmatpush3.bf16.msra.mxu1 %v497_v15  ;;  %v47_v33 = vrot.slane %v42_v31, %v46_v30  ;;  %v51_v34 = vrot.slane %v42_v31, %v50_v32 }
  0x18   :  { %461 = vmatprep.subr.bf16.mxu1 %v498_v16 }
  0x1b   :  { %462 = vmatpush3.bf16.msra.mxu1 %v499_v17 }
  0x1c   :  { %463 = vmatprep.subr.bf16.mxu1 %v500_v18 }
  0x1f   :  { %464 = vmatpush3.bf16.msra.mxu1 %v501_v19 }
  0x20   :  { %465 = vmatprep.subr.bf16.mxu1 %v502_v20 }
  0x23   :  { %466 = vmatpush3.bf16.msra.mxu1 %v503_v21 }
  0x24   :  { %467 = vmatprep.subr.bf16.mxu1 %v504_v22 }
  0x27   :  { %468 = vmatpush3.bf16.msra.mxu1 %v505_v23 }
  0x28   :  { %469 = vmatprep.subr.bf16.mxu1 %v506_v24 }
  0x2b   :  { %470 = vmatpush3.bf16.msra.mxu1 %v507_v25  ;;  %v438_v25 = vld [vmem:[%s709_s4] ss:$0 sm:$0xff] }
  0x2c   :  { %471 = vmatprep.subr.bf16.mxu1 %v508_v26 }
  0x2f   :  { %472 = vmatpush3.bf16.msra.mxu1 %v509_v27 }
  0x74   :  { %v620_v10 = vpop.permute.xlu0 %30 }
  0x75   :  { %v33_v11 = vpack.c.bf16 %v620_v10, %v592_v0 }
  0x77   :  { %437 = vmatmul.mubr.msk.bf16.vlgmr.msra.gmra.mrb[0].mxu0 %vm94_vm0, %v33_v11 }
 0x14a   :  { %v132_v35 = vpop.f32.mrb[0].mxu0 }
 0x14b   :  { %v133_v36 = vadd.f32 %v132_v35, %v47_v33  ;;  %v134_v37 = vpop.f32.mrb[1].mxu0 }
 0x14c   :  { %v135_v38 = vadd.f32 %v134_v37, %v51_v34  ;;  %v136_v39 = vpop.f32.mrb[2].mxu0 }
 0x14d   :  { %v145_v40 = vmul.f32 0.044715, %v133_v36  ;;  %v137_v41 = vadd.f32 %v136_v39, %v47_v33  ;;  %v138_v42 = vpop.f32.mrb[3].mxu0  ;;  %v141_v6 = vmul.f32 0.5, %v133_v36 }
 0x14e   :  { %v146_v43 = vmul.f32 0.044715, %v135_v38  ;;  %v139_v44 = vadd.f32 %v138_v42, %v51_v34  ;;  %v142_v9 = vmul.f32 0.5, %v135_v38 }
 0x14f   :  { %v149_v45 = vmul.f32 %v145_v40, %v133_v36  ;;  %v147_v46 = vmul.f32 0.044715, %v137_v41  ;;  %v143_v7 = vmul.f32 0.5, %v137_v41 }
 0x150   :  { %v148_v47 = vmul.f32 0.044715, %v139_v44  ;;  %v150_v48 = vmul.f32 %v146_v43, %v135_v38  ;;  %v144_v11 = vmul.f32 0.5, %v139_v44 }
 0x151   :  { %v153_v49 = vmul.f32 %v149_v45, %v133_v36  ;;  %v151_v50 = vmul.f32 %v147_v46, %v137_v41 }
 0x152   :  { %v152_v51 = vmul.f32 %v148_v47, %v139_v44  ;;  %v154_v52 = vmul.f32 %v150_v48, %v135_v38 }
 0x153   :  { %v155_v53 = vmul.f32 %v151_v50, %v137_v41  ;;  %v157_v54 = vadd.f32 %v153_v49, %v133_v36 }
 0x154   :  { %v156_v55 = vmul.f32 %v152_v51, %v139_v44  ;;  %v158_v56 = vadd.f32 %v154_v52, %v135_v38  ;;  %v455_v52 = vld [vmem:[%s710_s5] ss:$0 sm:$0xff]  ;;  %s522_s5 = scalar_lea.vmem %s422_s0, 64 }
 0x155   :  { %v159_v57 = vadd.f32 %v155_v53, %v137_v41  ;;  %v161_v58 = vmul.f32 0.7978846, %v157_v54  ;;  %v456_v54 = vld [vmem:[%s711_s6] ss:$0 sm:$0xff]  ;;  %p523_p0 = scmp.ne.s32.totalorder %s422_s0, %s522_s5  ;;  %p528_p2 = scmp.lt.s32.totalorder %s522_s5, %s522_s5 }
 0x156   :  { %v160_v59 = vadd.f32 %v156_v55, %v139_v44  ;;  %v162_v60 = vmul.f32 0.7978846, %v158_v56 }
 0x157   :  { %v163_v61 = vmul.f32 0.7978846, %v159_v57  ;;  %510 = vtanh.f32 %v161_v58  ;;  %p529_p3 = por %p528_p2, %p527_p1 }
 0x158   :  { %v164_v62 = vmul.f32 0.7978846, %v160_v59  ;;  %512 = vtanh.f32 %v162_v60 }
 0x159   :  { %514 = vtanh.f32 %v163_v61  ;;  %p530_p4 = pnand %p529_p3, %p523_p0 }
 0x15a   :  { %516 = vtanh.f32 %v164_v62 }
 0x161   :  { %v511_v63 = vpop.eup %510 }
 0x162   :  { %v513_v1 = vpop.eup %512  ;;  %v169_v2 = vadd.f32 1.0, %v511_v63 }
 0x163   :  { %v515_v3 = vpop.eup %514  ;;  %v170_v4 = vadd.f32 1.0, %v513_v1 }
 0x164   :  { %v517_v5 = vpop.eup %516  ;;  %v171_v8 = vadd.f32 1.0, %v515_v3  ;;  %v173_v13 = vmul.f32 %v169_v2, %v141_v6 }
 0x165   :  { %v172_v12 = vadd.f32 1.0, %v517_v5  ;;  %v174_v15 = vmul.f32 %v170_v4, %v142_v9 }
 0x166   :  { %v175_v14 = vmul.f32 %v171_v8, %v143_v7 }
 0x167   :  { %v176_v16 = vmul.f32 %v172_v12, %v144_v11 }
 0x168   :  { %v177_v17 = vpack.c.bf16 %v175_v14, %v173_v13 }
 0x169   :  { %v178_v18 = vpack.c.bf16 %v176_v16, %v174_v15 }
 0x16b   :  { %346 = vmatprep.mubr.bf16.mxu1 %v178_v18 }
 0x16c   :  { %347 = vmatmul.mubr.bf16.vlgmr.msra.gmra.mrb[0].mxu1 %v177_v17 }
 0x23f   :  { %v473_v19 = vpop.f32.mrb[0].mxu1 }
 0x240   :  { %v474_v20 = vpop.f32.mrb[1].mxu1 }
 0x241   :  { %v475_v21 = vadd.f32 %v474_v20, %v473_v19  ;;  %v476_v22 = vpop.f32.mrb[2].mxu1 }
 0x242   :  { %v477_v23 = vpop.f32.mrb[3].mxu1 }
 0x243   :  { %v478_v24 = vadd.f32 %v477_v23, %v476_v22  ;;  %v349_v27 = vadd.f32 %v475_v21, %v438_v25 }
 0x245   :  { %v352_v26 = vadd.f32 %v478_v24, %v438_v25  ;;  %v355_v31 = vadd.f32 %v349_v27, %v592_v0 }
 0x247   :  { %v356_v28 = vadd.f32 %v352_v26, %v620_v10  ;;  %v359_v33 = vsel %vm94_vm0, %v355_v31, 0.0  ;;  %v368_v34 = vmul.f32 %v355_v31, %v355_v31 }
 0x249   :  { %v362_v29 = vsel %vm94_vm0, %v356_v28, 0.0  ;;  %v369_v30 = vmul.f32 %v356_v28, %v356_v28  ;;  %v370_v35 = vsel %vm94_vm0, %v368_v34, 0.0 }
 0x24a   :  { %363 = vadd.xlane.f32.xlu0 %v362_v29 }
 0x24b   :  { %v373_v32 = vsel %vm94_vm0, %v369_v30, 0.0 }
 0x24c   :  { %374 = vadd.xlane.f32.xlu1 %v373_v32 }
 0x250   :  { %360 = vadd.xlane.f32.xlu1 %v359_v33 }
 0x254   :  { %371 = vadd.xlane.f32.xlu1 %v370_v35 }
 0x2d7   :  { %v364_v36 = vpop.xlane.xlu0 %363 }
 0x2d8   :  { %v367_v37 = vmul.f32 0.015625, %v364_v36 }
 0x2d9   :  { %v375_v38 = vpop.xlane.xlu1 %374 }
 0x2da   :  { %v379_v10 = vmul.f32 %v367_v37, %v367_v37  ;;  %v377_v39 = vmul.f32 0.015625, %v375_v38  ;;  %v385_v50 = vsub.f32 %v356_v28, %v367_v37 }
 0x2dc   :  { %v381_v40 = vsub.f32 %v377_v39, %v379_v10 }
 0x2dd   :  { %v361_v41 = vpop.xlane.xlu1 %360 }
 0x2de   :  { %v383_v42 = vmax.f32 %v381_v40, 0.0  ;;  %v366_v43 = vmul.f32 0.015625, %v361_v41 }
 0x2e0   :  { %v387_v0 = vadd.f32 1e-05, %v383_v42  ;;  %v378_v45 = vmul.f32 %v366_v43, %v366_v43  ;;  %v384_v57 = vsub.f32 %v355_v31, %v366_v43 }
 0x2e1   :  { %v372_v44 = vpop.xlane.xlu1 %371 }
 0x2e2   :  { %518 = vrsqrt.f32 %v387_v0  ;;  %v376_v46 = vmul.f32 0.015625, %v372_v44 }
 0x2e4   :  { %v380_v47 = vsub.f32 %v376_v46, %v378_v45 }
 0x2e6   :  { %v382_v48 = vmax.f32 %v380_v47, 0.0 }
 0x2e8   :  { %v386_v49 = vadd.f32 1e-05, %v382_v48 }
 0x2ea   :  { %520 = vrsqrt.f32 %v386_v49 }
 0x2ec   :  { %v519_v51 = vpop.eup %518 }
 0x2ed   :  { %v391_v53 = vmul.f32 %v519_v51, %v385_v50 }
 0x2ef   :  { %v399_v55 = vmul.f32 %v455_v52, %v391_v53 }
 0x2f1   :  { %v407_v56 = vadd.f32 %v456_v54, %v399_v55 }
 0x2f3   :  { %409 = vrot.lane.b32.xlu1 %v407_v56, %s546_s26 }
 0x2f4   :  { %v521_v58 = vpop.eup %520 }
 0x2f5   :  { %v390_v59 = vmul.f32 %v521_v58, %v384_v57 }
 0x2f7   :  { %v398_v60 = vmul.f32 %v455_v52, %v390_v59 }
 0x2f9   :  { %v406_v61 = vadd.f32 %v456_v54, %v398_v60 }
 0x365   :  { %v410_v62 = vpop.permute.xlu1 %409 }
 0x366   :  { %v412_v63 = vsel %vm94_vm0, %v406_v61, %v410_v62 }
 0x367   :  { %v413_v1 = vpack.c.bf16 %v412_v63, %v412_v63 }
 0x369   :  { %414 = vst [vmem:[#allocation2] sm:$0xf] %v413_v1 }
 0x36a   :  { %533 = shalt.err (!%p530_p4)
}
 0x36b   :  { %s534_s10 = scalar_lea.hbm %s712_s7, 64 }
 0x36c   :  { %p535_p5 = scmp.ne.s32.totalorder %s712_s7, %s534_s10  ;;  %p538_p6 = scmp.lt.u32.totalorder %s534_s10, %s712_s7 }
 0x36e   :  { %p540_p7 = pnand %p538_p6, %p535_p5 }
 0x370   :  { %543 = shalt.err (!%p540_p7)
}
 0x371   :  { %424 = dma.vmem_to_hbm [thread:$0]  %s422_s0, 64, %s712_s7, [#allocation3]  }
 0x372   :  { %544 = dma.done.wait [#allocation3], 64  }
 0x373   :  { %545 = vsyncadd [#allocation3], 4294967232 }
 0x374   :  { %428 = vsyncpa [#allocation3], 1 }

</bundles_post_ra>
